<compile_context>
chip_gen: v6e
topology: v6e:2x2x1
jax: 0.10.0
libtpu: 0.0.40
codegen_flags: <defaults>
</compile_context>

<pallas_src>
import jax
import jax.numpy as jnp
from jax.experimental import pallas as pl
from jax.experimental.pallas import tpu as pltpu


def _round_up(x, m):
    return ((x + m - 1) // m) * m


# ----------------------------------------------------------------------------
# Pallas kernel: one 3x3 conv layer (folded BN) on a per-image flat slab.
# ----------------------------------------------------------------------------
def make_conv_kernel(offsets, pad_l, p_len, cout, pt, apply_relu,
                     fuse_residual_sigmoid):
    def kernel(x_ref, w_ref, b_ref, mask_ref, *rest):
        if fuse_residual_sigmoid:
            x_in_ref, o_ref = rest
        else:
            (o_ref,) = rest

        x = x_ref[0]                                     # (Cin, Pt) bf16
        acc = None
        for t, d in enumerate(offsets):                  # 9 static tap shifts
            xt = x[:, pad_l + d: pad_l + d + p_len]      # (Cin, P) shifted view
            part = jnp.dot(w_ref[t], xt,                 # MXU, f32 accumulate
                           preferred_element_type=jnp.float32)
            acc = part if acc is None else acc + part

        y = acc + b_ref[...]                             # bias (Cout, 1), f32
        if apply_relu:
            y = jnp.maximum(y, 0.0)
        if fuse_residual_sigmoid:
            x_in = x_in_ref[0, :, pad_l: pad_l + p_len]  # (Cout, P) f32
            y = jax.nn.sigmoid(x_in - y)
        y = y * mask_ref[...]                            # re-zero padded border

        # Zero the flat-pad strips, then store the lane-dense interior.
        o_ref[0] = jnp.zeros((cout, pt), o_ref.dtype)
        o_ref[0, :, pad_l: pad_l + p_len] = y.astype(o_ref.dtype)

    return kernel


def conv3x3_layer(slab, w9, b2, mask, x_in_slab, *, pad_l, p_len, wp,
                  apply_relu, fuse_residual_sigmoid, out_dtype):
    """slab: (N, Cin, Pt) bf16; w9: (9, Cout, Cin) bf16; b2: (Cout, 1) f32;
    mask: (1, P) f32; x_in_slab: (N, Cn, Pt) f32 (last layer only) or None."""
    n, cin, pt = slab.shape
    cout = w9.shape[1]

    offsets = [(kh - 1) * wp + (kw - 1) for kh in range(3) for kw in range(3)]
    kernel = make_conv_kernel(offsets, pad_l, p_len, cout, pt, apply_relu,
                              fuse_residual_sigmoid)

    in_specs = [
        pl.BlockSpec((1, cin, pt), lambda i: (i, 0, 0)),    # activation slab
        pl.BlockSpec((9, cout, cin), lambda i: (0, 0, 0)),  # folded weights
        pl.BlockSpec((cout, 1), lambda i: (0, 0)),          # folded bias
        pl.BlockSpec((1, p_len), lambda i: (0, 0)),         # interior mask
    ]
    args = [slab, w9, b2, mask]
    if fuse_residual_sigmoid:
        cn = x_in_slab.shape[1]
        in_specs.append(pl.BlockSpec((1, cn, pt), lambda i: (i, 0, 0)))
        args.append(x_in_slab)

    return pl.pallas_call(
        kernel,
        out_shape=jax.ShapeDtypeStruct((n, cout, pt), out_dtype),
        grid_spec=pltpu.PrefetchScalarGridSpec(
            num_scalar_prefetch=0,
            grid=(n,),
            in_specs=in_specs,
            out_specs=pl.BlockSpec((1, cout, pt), lambda i: (i, 0, 0)),
        ),
        compiler_params=pltpu.CompilerParams(
            dimension_semantics=("parallel",)),
    )(*args)


# ----------------------------------------------------------------------------
# Host-side glue: slab layout conversion, BN folding, parameter init.
# ----------------------------------------------------------------------------
def to_slab(x_nchw, pad_l, pad_r, dtype):
    n, c, h, w = x_nchw.shape
    xp = jnp.pad(x_nchw, ((0, 0), (0, 0), (1, 1), (1, 1)))       # spatial pad=1
    flat = xp.reshape(n, c, (h + 2) * (w + 2))
    return jnp.pad(flat, ((0, 0), (0, 0), (pad_l, pad_r))).astype(dtype)


def from_slab(slab, n, c, h, w, pad_l):
    hp, wp = h + 2, w + 2
    flat = slab[:, :, pad_l: pad_l + hp * wp]
    return flat.reshape(n, c, hp, wp)[:, :, 1:h + 1, 1:w + 1]


def make_interior_mask(h, w):
    hp, wp = h + 2, w + 2
    row = (jnp.arange(hp) >= 1) & (jnp.arange(hp) <= h)
    col = (jnp.arange(wp) >= 1) & (jnp.arange(wp) <= w)
    return (row[:, None] & col[None, :]).astype(jnp.float32).reshape(1, hp * wp)


def prep_layer_params(p):
    """Fold eval-mode BN affine into conv weight/bias; transpose for the
    channels-in-sublanes kernel layout."""
    w, b, scale, shift = p["w"], p["b"], p["scale"], p["shift"]
    wf = w * scale                               # (3,3,Cin,Cout) * (Cout,)
    bf = b * scale + shift
    cin, cout = w.shape[2], w.shape[3]
    w9 = jnp.transpose(wf, (0, 1, 3, 2)).reshape(9, cout, cin)
    return w9.astype(jnp.bfloat16), bf.reshape(cout, 1).astype(jnp.float32)


def init_dncnn_params(key, n_channels, num_features, num_layers):
    """Deterministic init matching DnCNN._initialize_weights shapes/semantics."""
    params = []
    cins = [n_channels] + [num_features] * (num_layers - 1)
    couts = [num_features] * (num_layers - 1) + [n_channels]
    for li in range(num_layers):
        key, wk = jax.random.split(key)
        cin, cout = cins[li], couts[li]
        fan_in = cin * 9
        std = (2.0 / fan_in) ** 0.5  # kaiming_normal_, fan_in, relu gain
        w = std * jax.random.normal(wk, (3, 3, cin, cout), jnp.float32)
        b = jnp.zeros((cout,), jnp.float32)
        has_bn = (0 < li < num_layers - 1)
        if has_bn:
            # BatchNorm2d eval mode, default running stats (mean=0, var=1,
            # gamma=1, beta=0, eps=1e-5) -> identity scale/shift after folding.
            eps = 1e-5
            scale = jnp.ones((cout,), jnp.float32) / jnp.sqrt(1.0 + eps)
            shift = jnp.zeros((cout,), jnp.float32)
        else:
            scale = jnp.ones((cout,), jnp.float32)
            shift = jnp.zeros((cout,), jnp.float32)
        params.append(dict(w=w, b=b, scale=scale, shift=shift, has_bn=has_bn))
    return params


# ----------------------------------------------------------------------------
# Forward pass and pure-JAX reference.
# ----------------------------------------------------------------------------
def dncnn_forward(x_nchw, params):
    """DnCNN forward: sigmoid(input - layers(input)); adaptive_layer_type=None."""
    x = x_nchw.astype(jnp.float32)
    n, cn, h, w = x.shape
    hp, wp = h + 2, w + 2
    p_len = hp * wp
    pad_l = _round_up(wp + 1, 128)                # lane-aligned left flat pad
    pt = pad_l + _round_up(p_len + wp + 1, 128)   # total slab width, %128 == 0
    pad_r = pt - pad_l - p_len

    x_in_slab = to_slab(x, pad_l, pad_r, jnp.float32)   # residual input (f32)
    mask = make_interior_mask(h, w)

    hslab = x_in_slab.astype(jnp.bfloat16)
    num_layers = len(params)
    for li, p in enumerate(params):
        is_last = li == num_layers - 1
        w9, b2 = prep_layer_params(p)
        hslab = conv3x3_layer(
            hslab, w9, b2, mask,
            x_in_slab if is_last else None,
            pad_l=pad_l, p_len=p_len, wp=wp,
            apply_relu=not is_last,
            fuse_residual_sigmoid=is_last,
            out_dtype=jnp.float32 if is_last else jnp.bfloat16)
    return from_slab(hslab, n, cn, h, w, pad_l)


def dncnn_reference(x_nchw, params):
    """Pure-JAX f32 reference matching the PyTorch module (eval-mode BN)."""
    x = x_nchw.astype(jnp.float32)
    h = x
    num_layers = len(params)
    for li, p in enumerate(params):
        y = jax.lax.conv_general_dilated(
            h, p["w"], window_strides=(1, 1), padding="SAME",
            dimension_numbers=("NCHW", "HWIO", "NCHW"),
            precision=jax.lax.Precision.HIGHEST)
        y = y + p["b"][None, :, None, None]
        y = y * p["scale"][None, :, None, None] + p["shift"][None, :, None, None]
        if li < num_layers - 1:
            y = jnp.maximum(y, 0.0)
        h = y
    return jax.nn.sigmoid(x - h)


if __name__ == "__main__":
    key = jax.random.PRNGKey(0)
    k_in, k_par = jax.random.split(key)

    n_channels, num_features, num_layers = 4, 16, 4
    n, h, w = 2, 16, 16

    x = jax.random.normal(k_in, (n, n_channels, h, w), jnp.float32)
    params = init_dncnn_params(k_par, n_channels, num_features, num_layers)

    out = jax.block_until_ready(dncnn_forward(x, params))
    assert out.shape == (n, n_channels, h, w)
    assert bool(jnp.all(jnp.isfinite(out)))

    ref = jax.block_until_ready(dncnn_reference(x, params))
    max_err = float(jnp.max(jnp.abs(out - ref)))
    assert max_err < 5e-2, f"max abs error vs reference: {max_err}"

    print("KERNEL_OK")
</pallas_src>

<mosaic_0001>
module attributes {stable_mosaic.version = 11 : i64} {
  func.func @kernel(%arg0: i32, %arg1: memref<1x4x512xbf16, #tpu.memory_space<vmem>>, %arg2: memref<9x16x4xbf16, #tpu.memory_space<vmem>>, %arg3: memref<16x1xf32, #tpu.memory_space<vmem>>, %arg4: memref<1x324xf32, #tpu.memory_space<vmem>>, %arg5: memref<1x16x512xbf16, #tpu.memory_space<vmem>>) attributes {dimension_semantics = [#tpu.dimension_semantics<parallel>], iteration_bounds = array<i64: 2>, scalar_prefetch = 0 : i64, scratch_operands = 0 : i64, tpu.core_type = #tpu.core_type<tc>, window_params = [{transform_indices = @transform_0, window_bounds = array<i64: 1, 4, 512>}, {pipeline_mode = #tpu.pipeline_mode<synchronous>, transform_indices = @transform_1, window_bounds = array<i64: 9, 16, 4>}, {pipeline_mode = #tpu.pipeline_mode<synchronous>, transform_indices = @transform_2, window_bounds = array<i64: 16, 1>}, {pipeline_mode = #tpu.pipeline_mode<synchronous>, transform_indices = @transform_3, window_bounds = array<i64: 1, 324>}, {transform_indices = @transform_4, window_bounds = array<i64: 1, 16, 512>}]} {
    %c0 = arith.constant 0 : index
    %c0_0 = arith.constant 0 : index
    %c0_1 = arith.constant 0 : index
    %0 = vector.load %arg1[%c0, %c0_0, %c0_1] : memref<1x4x512xbf16, #tpu.memory_space<vmem>>, vector<1x4x512xbf16>
    %1 = vector.shape_cast %0 : vector<1x4x512xbf16> to vector<4x512xbf16>
    %2 = vector.extract_strided_slice %1 {offsets = [0, 109], sizes = [4, 324], strides = [1, 1]} : vector<4x512xbf16> to vector<4x324xbf16>
    %c0_2 = arith.constant 0 : index
    %c0_3 = arith.constant 0 : index
    %c0_4 = arith.constant 0 : index
    %3 = vector.load %arg2[%c0_2, %c0_3, %c0_4] : memref<9x16x4xbf16, #tpu.memory_space<vmem>>, vector<1x16x4xbf16>
    %4 = vector.shape_cast %3 : vector<1x16x4xbf16> to vector<16x4xbf16>
    %cst = arith.constant dense<0.000000e+00> : vector<16x324xf32>
    %5 = tpu.matmul %4, %2, %cst {dimension_numbers = #tpu.dot_dimension_numbers<[1], [0], [0], [1], [0, 0, 1, 1], [], []>} : vector<16x4xbf16>, vector<4x324xbf16>, vector<16x324xf32> -> vector<16x324xf32>
    %6 = vector.extract_strided_slice %1 {offsets = [0, 110], sizes = [4, 324], strides = [1, 1]} : vector<4x512xbf16> to vector<4x324xbf16>
    %c1 = arith.constant 1 : index
    %c0_5 = arith.constant 0 : index
    %c0_6 = arith.constant 0 : index
    %7 = vector.load %arg2[%c1, %c0_5, %c0_6] : memref<9x16x4xbf16, #tpu.memory_space<vmem>>, vector<1x16x4xbf16>
    %8 = vector.shape_cast %7 : vector<1x16x4xbf16> to vector<16x4xbf16>
    %cst_7 = arith.constant dense<0.000000e+00> : vector<16x324xf32>
    %9 = tpu.matmul %8, %6, %cst_7 {dimension_numbers = #tpu.dot_dimension_numbers<[1], [0], [0], [1], [0, 0, 1, 1], [], []>} : vector<16x4xbf16>, vector<4x324xbf16>, vector<16x324xf32> -> vector<16x324xf32>
    %10 = arith.addf %5, %9 : vector<16x324xf32>
    %11 = vector.extract_strided_slice %1 {offsets = [0, 111], sizes = [4, 324], strides = [1, 1]} : vector<4x512xbf16> to vector<4x324xbf16>
    %c2 = arith.constant 2 : index
    %c0_8 = arith.constant 0 : index
    %c0_9 = arith.constant 0 : index
    %12 = vector.load %arg2[%c2, %c0_8, %c0_9] : memref<9x16x4xbf16, #tpu.memory_space<vmem>>, vector<1x16x4xbf16>
    %13 = vector.shape_cast %12 : vector<1x16x4xbf16> to vector<16x4xbf16>
    %cst_10 = arith.constant dense<0.000000e+00> : vector<16x324xf32>
    %14 = tpu.matmul %13, %11, %cst_10 {dimension_numbers = #tpu.dot_dimension_numbers<[1], [0], [0], [1], [0, 0, 1, 1], [], []>} : vector<16x4xbf16>, vector<4x324xbf16>, vector<16x324xf32> -> vector<16x324xf32>
    %15 = arith.addf %10, %14 : vector<16x324xf32>
    %16 = vector.extract_strided_slice %1 {offsets = [0, 127], sizes = [4, 324], strides = [1, 1]} : vector<4x512xbf16> to vector<4x324xbf16>
    %c3 = arith.constant 3 : index
    %c0_11 = arith.constant 0 : index
    %c0_12 = arith.constant 0 : index
    %17 = vector.load %arg2[%c3, %c0_11, %c0_12] : memref<9x16x4xbf16, #tpu.memory_space<vmem>>, vector<1x16x4xbf16>
    %18 = vector.shape_cast %17 : vector<1x16x4xbf16> to vector<16x4xbf16>
    %cst_13 = arith.constant dense<0.000000e+00> : vector<16x324xf32>
    %19 = tpu.matmul %18, %16, %cst_13 {dimension_numbers = #tpu.dot_dimension_numbers<[1], [0], [0], [1], [0, 0, 1, 1], [], []>} : vector<16x4xbf16>, vector<4x324xbf16>, vector<16x324xf32> -> vector<16x324xf32>
    %20 = arith.addf %15, %19 : vector<16x324xf32>
    %21 = vector.extract_strided_slice %1 {offsets = [0, 128], sizes = [4, 324], strides = [1, 1]} : vector<4x512xbf16> to vector<4x324xbf16>
    %c4 = arith.constant 4 : index
    %c0_14 = arith.constant 0 : index
    %c0_15 = arith.constant 0 : index
    %22 = vector.load %arg2[%c4, %c0_14, %c0_15] : memref<9x16x4xbf16, #tpu.memory_space<vmem>>, vector<1x16x4xbf16>
    %23 = vector.shape_cast %22 : vector<1x16x4xbf16> to vector<16x4xbf16>
    %cst_16 = arith.constant dense<0.000000e+00> : vector<16x324xf32>
    %24 = tpu.matmul %23, %21, %cst_16 {dimension_numbers = #tpu.dot_dimension_numbers<[1], [0], [0], [1], [0, 0, 1, 1], [], []>} : vector<16x4xbf16>, vector<4x324xbf16>, vector<16x324xf32> -> vector<16x324xf32>
    %25 = arith.addf %20, %24 : vector<16x324xf32>
    %26 = vector.extract_strided_slice %1 {offsets = [0, 129], sizes = [4, 324], strides = [1, 1]} : vector<4x512xbf16> to vector<4x324xbf16>
    %c5 = arith.constant 5 : index
    %c0_17 = arith.constant 0 : index
    %c0_18 = arith.constant 0 : index
    %27 = vector.load %arg2[%c5, %c0_17, %c0_18] : memref<9x16x4xbf16, #tpu.memory_space<vmem>>, vector<1x16x4xbf16>
    %28 = vector.shape_cast %27 : vector<1x16x4xbf16> to vector<16x4xbf16>
    %cst_19 = arith.constant dense<0.000000e+00> : vector<16x324xf32>
    %29 = tpu.matmul %28, %26, %cst_19 {dimension_numbers = #tpu.dot_dimension_numbers<[1], [0], [0], [1], [0, 0, 1, 1], [], []>} : vector<16x4xbf16>, vector<4x324xbf16>, vector<16x324xf32> -> vector<16x324xf32>
    %30 = arith.addf %25, %29 : vector<16x324xf32>
    %31 = vector.extract_strided_slice %1 {offsets = [0, 145], sizes = [4, 324], strides = [1, 1]} : vector<4x512xbf16> to vector<4x324xbf16>
    %c6 = arith.constant 6 : index
    %c0_20 = arith.constant 0 : index
    %c0_21 = arith.constant 0 : index
    %32 = vector.load %arg2[%c6, %c0_20, %c0_21] : memref<9x16x4xbf16, #tpu.memory_space<vmem>>, vector<1x16x4xbf16>
    %33 = vector.shape_cast %32 : vector<1x16x4xbf16> to vector<16x4xbf16>
    %cst_22 = arith.constant dense<0.000000e+00> : vector<16x324xf32>
    %34 = tpu.matmul %33, %31, %cst_22 {dimension_numbers = #tpu.dot_dimension_numbers<[1], [0], [0], [1], [0, 0, 1, 1], [], []>} : vector<16x4xbf16>, vector<4x324xbf16>, vector<16x324xf32> -> vector<16x324xf32>
    %35 = arith.addf %30, %34 : vector<16x324xf32>
    %36 = vector.extract_strided_slice %1 {offsets = [0, 146], sizes = [4, 324], strides = [1, 1]} : vector<4x512xbf16> to vector<4x324xbf16>
    %c7 = arith.constant 7 : index
    %c0_23 = arith.constant 0 : index
    %c0_24 = arith.constant 0 : index
    %37 = vector.load %arg2[%c7, %c0_23, %c0_24] : memref<9x16x4xbf16, #tpu.memory_space<vmem>>, vector<1x16x4xbf16>
    %38 = vector.shape_cast %37 : vector<1x16x4xbf16> to vector<16x4xbf16>
    %cst_25 = arith.constant dense<0.000000e+00> : vector<16x324xf32>
    %39 = tpu.matmul %38, %36, %cst_25 {dimension_numbers = #tpu.dot_dimension_numbers<[1], [0], [0], [1], [0, 0, 1, 1], [], []>} : vector<16x4xbf16>, vector<4x324xbf16>, vector<16x324xf32> -> vector<16x324xf32>
    %40 = arith.addf %35, %39 : vector<16x324xf32>
    %41 = vector.extract_strided_slice %1 {offsets = [0, 147], sizes = [4, 324], strides = [1, 1]} : vector<4x512xbf16> to vector<4x324xbf16>
    %c8 = arith.constant 8 : index
    %c0_26 = arith.constant 0 : index
    %c0_27 = arith.constant 0 : index
    %42 = vector.load %arg2[%c8, %c0_26, %c0_27] : memref<9x16x4xbf16, #tpu.memory_space<vmem>>, vector<1x16x4xbf16>
    %43 = vector.shape_cast %42 : vector<1x16x4xbf16> to vector<16x4xbf16>
    %cst_28 = arith.constant dense<0.000000e+00> : vector<16x324xf32>
    %44 = tpu.matmul %43, %41, %cst_28 {dimension_numbers = #tpu.dot_dimension_numbers<[1], [0], [0], [1], [0, 0, 1, 1], [], []>} : vector<16x4xbf16>, vector<4x324xbf16>, vector<16x324xf32> -> vector<16x324xf32>
    %45 = arith.addf %40, %44 : vector<16x324xf32>
    %c0_29 = arith.constant 0 : index
    %c0_30 = arith.constant 0 : index
    %46 = vector.load %arg3[%c0_29, %c0_30] : memref<16x1xf32, #tpu.memory_space<vmem>>, vector<16x1xf32>
    %47 = vector.broadcast %46 : vector<16x1xf32> to vector<16x324xf32>
    %48 = arith.addf %45, %47 : vector<16x324xf32>
    %cst_31 = arith.constant 0.000000e+00 : f32
    %49 = vector.broadcast %cst_31 : f32 to vector<16x324xf32>
    %50 = arith.maximumf %48, %49 : vector<16x324xf32>
    %c0_32 = arith.constant 0 : index
    %c0_33 = arith.constant 0 : index
    %51 = vector.load %arg4[%c0_32, %c0_33] : memref<1x324xf32, #tpu.memory_space<vmem>>, vector<1x324xf32>
    %52 = vector.broadcast %51 : vector<1x324xf32> to vector<16x324xf32>
    %53 = arith.mulf %50, %52 : vector<16x324xf32>
    %cst_34 = arith.constant 0.000000e+00 : bf16
    %54 = vector.broadcast %cst_34 : bf16 to vector<16x512xbf16>
    %c0_35 = arith.constant 0 : index
    %c0_36 = arith.constant 0 : index
    %c0_37 = arith.constant 0 : index
    %55 = vector.load %arg5[%c0_35, %c0_36, %c0_37] : memref<1x16x512xbf16, #tpu.memory_space<vmem>>, vector<1x16x512xbf16>
    %56 = vector.shape_cast %55 : vector<1x16x512xbf16> to vector<16x512xbf16>
    %57 = vector.shape_cast %54 : vector<16x512xbf16> to vector<1x16x512xbf16>
    tpu.vector_store %arg5[%c0_35, %c0_36, %c0_37], %57 {strides = array<i32>} : memref<1x16x512xbf16, #tpu.memory_space<vmem>>, vector<1x16x512xbf16>,
    %58 = arith.truncf %53 : vector<16x324xf32> to vector<16x324xbf16>
    %c0_38 = arith.constant 0 : index
    %c0_39 = arith.constant 0 : index
    %c128 = arith.constant 128 : index
    %59 = vector.load %arg5[%c0_38, %c0_39, %c128] : memref<1x16x512xbf16, #tpu.memory_space<vmem>>, vector<1x16x324xbf16>
    %60 = vector.shape_cast %59 : vector<1x16x324xbf16> to vector<16x324xbf16>
    %61 = vector.shape_cast %58 : vector<16x324xbf16> to vector<1x16x324xbf16>
    tpu.vector_store %arg5[%c0_38, %c0_39, %c128], %61 {strides = array<i32>} : memref<1x16x512xbf16, #tpu.memory_space<vmem>>, vector<1x16x324xbf16>,
    return
  }
  func.func @transform_0(%arg0: i32) -> (i32, i32, i32) {
    %c0_i32 = arith.constant 0 : i32
    %c0_i32_0 = arith.constant 0 : i32
    %c0_i32_1 = arith.constant 0 : i32
    return %arg0, %c0_i32, %c0_i32_0 : i32, i32, i32
  }
  func.func @transform_1(%arg0: i32) -> (i32, i32, i32) {
    %c0_i32 = arith.constant 0 : i32
    %c0_i32_0 = arith.constant 0 : i32
    %c0_i32_1 = arith.constant 0 : i32
    %c0_i32_2 = arith.constant 0 : i32
    return %c0_i32, %c0_i32_0, %c0_i32_1 : i32, i32, i32
  }
  func.func @transform_2(%arg0: i32) -> (i32, i32) {
    %c0_i32 = arith.constant 0 : i32
    %c0_i32_0 = arith.constant 0 : i32
    %c0_i32_1 = arith.constant 0 : i32
    return %c0_i32, %c0_i32_0 : i32, i32
  }
  func.func @transform_3(%arg0: i32) -> (i32, i32) {
    %c0_i32 = arith.constant 0 : i32
    %c0_i32_0 = arith.constant 0 : i32
    %c0_i32_1 = arith.constant 0 : i32
    return %c0_i32, %c0_i32_0 : i32, i32
  }
  func.func @transform_4(%arg0: i32) -> (i32, i32, i32) {
    %c0_i32 = arith.constant 0 : i32
    %c0_i32_0 = arith.constant 0 : i32
    %c0_i32_1 = arith.constant 0 : i32
    return %arg0, %c0_i32, %c0_i32_0 : i32, i32, i32
  }
}

</mosaic_0001>

<bundles_post_ra>
// kernel: tpu_custom_call.1
= control target key start
LH: loop header
LB: loop body
LE: loop exit
PB: predicated region body
PF: predicated region fallthrough
CT: control target
= control target key end

     0   :  { %9 = vsyncpa [#allocation3], 0  ;;  %s2030_s0 = inlined_call_operand.vmem [shape: bf16[2,4,512], index: 0, kind: input, shape index: {}]   ;;  %s2031_s1 = inlined_call_operand.vmem [shape: bf16[9,16,4], index: 1, kind: input, shape index: {}]   ;;  %s2032_s2 = inlined_call_operand.vmem [shape: f32[16,1], index: 2, kind: input, shape index: {}]   ;;  %s2033_s3 = inlined_call_operand.vmem [shape: f32[1,324], index: 3, kind: input, shape index: {}]   ;;  %s2034_s4 = inlined_call_operand.hbm [shape: bf16[2,16,512], index: 4, kind: output, shape index: {}]  }
   0x1   :  { %11 = vsyncpa [#allocation3 + $0x1], 0  ;;  %s1744_s15 = smov 0   ;;  %s1746_s16 = smov 0  }
   0x2   :  { %s1748_s17 = smov 0   ;;  %s1750_s18 = smov 0  }
   0x3 LB: > { %s1765_s19 = sadd.s32 4294967295, %s1702_s18   ;;  %s1431_s20 = sadd.s32 4294967294, %s1702_s18   ;;  %s1702_s18 = sphi %s1750_s18, %s2040_s18   ;;  %s1698_s17 = sphi %s1748_s17, %s2039_s17   ;;  %s1694_s16 = sphi %s1746_s16, %s2038_s16   ;;  %s1690_s15 = sphi %s1744_s15, %s2037_s15  }
   0x4   : > { %s1769_s21 = sadd.s32 1, %s1702_s18   ;;  %s113_s22 = sadd.s32 1, %s1698_s17 }
   0x5   : > { %s110_s23 = ssub.s32 %s1702_s18, %s1769_s21  ;;  %p123_p0 = scmp.ne.s32.totalorder %s1698_s17, %s1694_s16 }
   0x6   : > { %p111_p1 = scmp.eq.s32.totalorder %s110_s23, 0  ;;  %p124_p2 = scmp.eq.s32.totalorder %s1765_s19, 1 }
   0x7   : > { %p129_p3 = scmp.ne.s32.totalorder %s1694_s16, %s1690_s15  ;;  %p130_p4 = scmp.eq.s32.totalorder %s1431_s20, 1 }
   0x8   : > { %s1780_s24 = scalar_select %p111_p1, %s1698_s17, %s113_s22  }
   0x9   : > { %p1782_p5 = por %p124_p2, %p123_p0  ;;  %p1786_p6 = por %p130_p4, %p129_p3 }
   0xa   : > { %p1434_p7 = scmp.ge.s32.totalorder %s1702_s18, 1  ;;  %p165_p8 = scmp.lt.s32.totalorder %s1702_s18, 3 }
   0xc   : > { %p166_p9 = pnand %p1434_p7, %p165_p8 }
   0xd   : > { %p191_p10 = scmp.lt.s32.totalorder (!%p166_p9), %s1765_s19, 1  ;;  %s1708_s6 = smov (!%p166_p9), 18  }
   0xe   : > { %169 = sbr.rel (%p166_p9) target bundleno = 439 (0x1b7), region = 36  ;;  %s1709_s7 = smov (!%p166_p9), 19  }
   0xf   : > { %s1710_s8 = smov (!%p166_p9), 17   ;;  %s1711_s9 = smov (!%p166_p9), 1  }
  0x10   : > { %s1712_s10 = smov (!%p166_p9), 127   ;;  %s1713_s11 = smov (!%p166_p9), 111  }
  0x11   : > { %s1714_s12 = smov (!%p166_p9), 110   ;;  %s1715_s13 = smov (!%p166_p9), 109  }
  0x13   : > { %v213_v0 = vlaneseq  ;;  %v1704_v1 = vmov 1983009808   ;;  %s192_s27 = scalar_select %p191_p10, %s1765_s19, 1  ;;  %v1705_v5 = vmov 0.0   ;;  %v1706_v6 = vmov 0   ;;  %v1279_v14 = vld [vmem:[%s2032_s2] sm:$0xff] }
  0x14   : > { %v211_v2 = vunpack.c.l.s4 %v1704_v1  ;;  %1523 = vmatprep.subr.bf16.mxu1 %v1705_v5  ;;  %284 = vmatprep.mubr.bf16.mxu0 %v1706_v6  ;;  %vm1707_vm0 = vmmov 0   ;;  %v1280_v15 = vld [vmem:[%s2032_s2 + $0x8] sm:$0xff]  ;;  %vm234_vm1 = vcmask 146432   ;;  %vm242_vm2 = vcmask 1041408   ;;  %v1634_v33 = vld [vmem:[%s2031_s1] sm:$0xff]   ;;  %v1635_v43 = vld [vmem:[%s2031_s1 + $0x10] sm:$0xff]  }
  0x15   : > { %v1794_v3 = vshrl.u32 %v213_v0, 7  ;;  %s1499_s28 = sshll.u32 %s192_s27, 3  ;;  %1630 = vset.pattern.permute.xlu0 %v1706_v6  ;;  %1631 = vset.pattern.permute.xlu1 %v1706_v6  ;;  %v1633_v23 = vld [vmem:[%s2031_s1 + $0x8] sm:$0xff]   ;;  %vm238_vm3 = vcmask 31744   ;;  %vm349_vm4 = vcmask 154624   ;;  %vm465_vm5 = vcmask 138240  }
  0x16   : > { %v212_v4 = vunpack.c.0.s8 %v211_v2  ;;  %s195_s5 = scalar_lea.vmem %s2030_s0, %s1499_s28  ;;  %1525 = vmatprep.mubr.msk.bf16.mxu1 %vm1707_vm0, %v1705_v5  ;;  %vm587_vm6 = vcmask 7168   ;;  %v1636_v53 = vld [vmem:[%s2031_s1 + $0x18] sm:$0xff]   ;;  %vm817_vm7 = vcmask 1039360   ;;  %v1637_v63 = vld [vmem:[%s2031_s1 + $0x20] sm:$0xff]   ;;  %vm936_vm8 = vcmask 908288   ;;  %s188_s28 = sand.u32 1, %s1694_s16  }
  0x17   : > { %v197_v8 = vld [vmem:[%s195_s5] sm:$0xff]  ;;  %vm1055_vm9 = vcmask 900096   ;;  %vm1174_vm10 = vcmask 891904   ;;  %s1435_s29 = sshll.u32 %s188_s28, 5  ;;  %vm1351_vm11 = vcmask 551936  }
  0x18   : > { %v215_v7 = vsub.s32 %v212_v4, %v1794_v3  ;;  %v209_v10 = vcombine.high %v197_v8, %v197_v8  ;;  %s1954_s30 = scalar_lea.vmem [#allocation2], %s1435_s29 }
  0x19   : > { %1326 = vst [vmem:[%s1954_s30] sm:$0xff] %v1706_v6  ;;  %1327 = vst [vmem:[%s1954_s30 + $0x8] sm:$0xff] %v1706_v6 }
  0x1a   : > { %v216_v9 = vrot.slane %v197_v8, %v215_v7  ;;  %v1806_v11 = vrot.slane %v209_v10, %v215_v7  ;;  %1328 = vst [vmem:[%s1954_s30 + $0x10] sm:$0xff] %v1706_v6  ;;  %1329 = vst [vmem:[%s1954_s30 + $0x18] sm:$0xff] %v1706_v6 }
  0x1c   : > { %226 = vrot.lane.b32.xlu0 %v216_v9, %s1708_s6  ;;  %v1808_v12 = vcombine.high %v216_v9, %v216_v9  ;;  %230 = vrot.lane.b32.xlu1 %v1806_v11, %s1708_s6  ;;  %v1813_v13 = vcombine.high %v1806_v11, %v1806_v11 }
  0x1e   : > { %v705_v57 = vsel %vm242_vm2, %v1808_v12, 0  ;;  %v711_v59 = vsel %vm242_vm2, %v1813_v13, 0 }
  0x20   : > { %228 = vrot.lane.b32.xlu0 %v1808_v12, %s1708_s6  ;;  %232 = vrot.lane.b32.xlu1 %v1813_v13, %s1708_s6 }
  0x24   : > { %341 = vrot.lane.b32.xlu0 %v216_v9, %s1709_s7  ;;  %343 = vrot.lane.b32.xlu1 %v1808_v12, %s1709_s7 }
  0x28   : > { %345 = vrot.lane.b32.xlu0 %v1806_v11, %s1709_s7  ;;  %347 = vrot.lane.b32.xlu1 %v1813_v13, %s1709_s7  ;;  %s1504_s7 = sshll.u32 %s1765_s19, 9  ;;  %s1990_s19 = scalar_lea.sflag [#allocation3], %s188_s28 }
  0x2c   : > { %457 = vrot.lane.b32.xlu0 %v216_v9, %s1710_s8  ;;  %459 = vrot.lane.b32.xlu1 %v1808_v12, %s1710_s8 }
  0x30   : > { %461 = vrot.lane.b32.xlu0 %v1806_v11, %s1710_s8  ;;  %463 = vrot.lane.b32.xlu1 %v1813_v13, %s1710_s8  ;;  %s1369_s8 = sshll.u32 %s1954_s30, 4  ;;  %s1983_s8 = int_to_ptr.vmem [resolvable:$true] %s1369_s8 }
  0x34   : > { %579 = vrot.lane.b32.xlu0 %v216_v9, %s1711_s9  ;;  %581 = vrot.lane.b32.xlu1 %v1808_v12, %s1711_s9 }
  0x38   : > { %583 = vrot.lane.b32.xlu0 %v1806_v11, %s1711_s9  ;;  %585 = vrot.lane.b32.xlu1 %v1813_v13, %s1711_s9 }
  0x3c   : > { %811 = vrot.lane.b32.xlu0 %v1808_v12, %s1712_s10  ;;  %813 = vrot.lane.b32.xlu1 %v1806_v11, %s1712_s10 }
  0x40   : > { %815 = vrot.lane.b32.xlu0 %v1813_v13, %s1712_s10  ;;  %930 = vrot.lane.b32.xlu1 %v1808_v12, %s1713_s11 }
  0x44   : > { %932 = vrot.lane.b32.xlu0 %v1806_v11, %s1713_s11  ;;  %934 = vrot.lane.b32.xlu1 %v1813_v13, %s1713_s11  ;;  %s1981_s11 = scalar_lea.hbm %s2034_s4, %s1504_s7 }
  0x48   : > { %1049 = vrot.lane.b32.xlu0 %v1808_v12, %s1714_s12  ;;  %1051 = vrot.lane.b32.xlu1 %v1806_v11, %s1714_s12 }
  0x4c   : > { %1053 = vrot.lane.b32.xlu0 %v1813_v13, %s1714_s12  ;;  %1168 = vrot.lane.b32.xlu1 %v1808_v12, %s1715_s13  ;;  %s1642_s12 = scalar_lea.vmem %s1983_s8, 512 }
  0x4d   : > { %p1643_p11 = scmp.ne.s32.totalorder %s1983_s8, %s1642_s12 }
  0x4f   : > { %p1644_p12 = pnand %p1643_p11, %p1782_p5 }
  0x50   : > { %1170 = vrot.lane.b32.xlu0 %v1806_v11, %s1715_s13  ;;  %1172 = vrot.lane.b32.xlu1 %v1813_v13, %s1715_s13  ;;  %s1716_s13 = smov [#allocation2]  }
  0x51   : > { %p1645_p13 = pneg %p1644_p12  ;;  %s1646_s14 = sshll.u32 %s1716_s13, 4  ;;  %s1647_s14 = int_to_ptr.vmem [resolvable:$false] %s1646_s14 }
  0x52   : > { %s1648_s20 = scalar_lea.vmem %s1647_s14, 1024  ;;  %p1649_p0 = scmp.lt.s32.totalorder %s1983_s8, %s1647_s14 }
  0x53   : > { %p1650_p1 = scmp.lt.s32.totalorder %s1648_s20, %s1642_s12 }
  0x54   : > { %1283 = vperm.xlu0 %1630, %v1279_v14   ;;  %1288 = vperm.xlu1 %1631, %v1280_v15  }
  0x55   : > { %p1651_p2 = por %p1650_p1, %p1649_p0 }
  0x57   : > { %p1652_p3 = pnand %p1651_p2, %p1645_p13 }
  0x8e   : > { %v227_v16 = vpop.permute.xlu0 %226  ;;  %v231_v17 = vpop.permute.xlu1 %230 }
  0x92   : > { %v229_v18 = vpop.permute.xlu0 %228  ;;  %v233_v21 = vpop.permute.xlu1 %232 }
  0x93   : > { %v236_v19 = vsel %vm234_vm1, %v229_v18, %v231_v17  ;;  %v235_v20 = vsel %vm234_vm1, %v227_v16, %v229_v18  ;;  %v237_v24 = vsel %vm234_vm1, %v231_v17, %v233_v21 }
  0x94   : > { %1441 = vmatprep.subr.msk.bf16.mxu0 %vm242_vm2, %v236_v19  ;;  %v244_v22 = vsel %vm242_vm2, %v235_v20, 0  ;;  %v250_v26 = vsel %vm242_vm2, %v237_v24, 0  ;;  %v1639_v19 = vld [vmem:[%s2031_s1 + $0x30] sm:$0xff]  }
  0x95   : > { %267 = vmatpush1.bf16.msra.mxu0 %v244_v22  ;;  %1524 = vmatpush3.bf16.msra.mxu1 %v250_v26  ;;  %v1640_v26 = vld [vmem:[%s2031_s1 + $0x38] sm:$0xff]  }
  0x96   : > { %v342_v25 = vpop.permute.xlu0 %341  ;;  %v344_v27 = vpop.permute.xlu1 %343  ;;  %1529 = vmatprep.subr.bf16.mxu1 %v1705_v5 }
  0x97   : > { %v350_v28 = vsel %vm349_vm4, %v342_v25, %v344_v27 }
  0x98   : > { %1442 = vmatmul.mubr.msk.bf16.vlgmr.msra.gmra.mxu0 %vm238_vm3, %v1633_v23  ;;  %1526 = vmatmul.mubr.msk.bf16.vlgmr.msra.gmra.mxu1 %vm238_vm3, %v1633_v23  ;;  %v357_v31 = vsel %vm242_vm2, %v350_v28, 0 }
  0x99   : > { %397 = vmatprep.mubr.bf16.mxu0 %v1706_v6  ;;  %1531 = vmatprep.mubr.msk.bf16.mxu1 %vm1707_vm0, %v1705_v5 }
  0x9a   : > { %v346_v29 = vpop.permute.xlu0 %345  ;;  %v348_v32 = vpop.permute.xlu1 %347 }
  0x9b   : > { %v351_v30 = vsel %vm349_vm4, %v344_v27, %v346_v29  ;;  %v352_v34 = vsel %vm349_vm4, %v346_v29, %v348_v32  ;;  %v1641_v29 = vld [vmem:[%s2031_s1 + $0x40] sm:$0xff]  }
  0x9c   : > { %1445 = vmatprep.subr.msk.bf16.mxu0 %vm242_vm2, %v351_v30  ;;  %v363_v35 = vsel %vm242_vm2, %v352_v34, 0 }
  0x9d   : > { %380 = vmatpush1.bf16.msra.mxu0 %v357_v31  ;;  %1530 = vmatpush3.bf16.msra.mxu1 %v363_v35 }
  0x9e   : > { %v458_v36 = vpop.permute.xlu0 %457  ;;  %v460_v37 = vpop.permute.xlu1 %459  ;;  %1535 = vmatprep.subr.bf16.mxu1 %v1705_v5 }
  0x9f   : > { %v466_v38 = vsel %vm465_vm5, %v458_v36, %v460_v37 }
  0xa0   : > { %1446 = vmatmul.mubr.msk.bf16.vlgmr.msra.gmra.mxu0 %vm238_vm3, %v1634_v33  ;;  %1532 = vmatmul.mubr.msk.bf16.vlgmr.msra.gmra.mxu1 %vm238_vm3, %v1634_v33  ;;  %v473_v41 = vsel %vm242_vm2, %v466_v38, 0 }
  0xa1   : > { %513 = vmatprep.mubr.bf16.mxu0 %v1706_v6  ;;  %1537 = vmatprep.mubr.msk.bf16.mxu1 %vm1707_vm0, %v1705_v5 }
  0xa2   : > { %v462_v39 = vpop.permute.xlu0 %461  ;;  %v464_v42 = vpop.permute.xlu1 %463 }
  0xa3   : > { %v467_v40 = vsel %vm465_vm5, %v460_v37, %v462_v39  ;;  %v468_v44 = vsel %vm465_vm5, %v462_v39, %v464_v42 }
  0xa4   : > { %1451 = vmatprep.subr.msk.bf16.mxu0 %vm242_vm2, %v467_v40  ;;  %v479_v45 = vsel %vm242_vm2, %v468_v44, 0 }
  0xa5   : > { %496 = vmatpush1.bf16.msra.mxu0 %v473_v41  ;;  %1536 = vmatpush3.bf16.msra.mxu1 %v479_v45 }
  0xa6   : > { %v580_v46 = vpop.permute.xlu0 %579  ;;  %v582_v47 = vpop.permute.xlu1 %581  ;;  %1541 = vmatprep.subr.bf16.mxu1 %v1705_v5 }
  0xa7   : > { %v588_v48 = vsel %vm587_vm6, %v580_v46, %v582_v47 }
  0xa8   : > { %1452 = vmatmul.mubr.msk.bf16.vlgmr.msra.gmra.mxu0 %vm238_vm3, %v1635_v43  ;;  %1538 = vmatmul.mubr.msk.bf16.vlgmr.msra.gmra.mxu1 %vm238_vm3, %v1635_v43  ;;  %v595_v51 = vsel %vm242_vm2, %v588_v48, 0 }
  0xa9   : > { %635 = vmatprep.mubr.bf16.mxu0 %v1706_v6  ;;  %1543 = vmatprep.mubr.msk.bf16.mxu1 %vm1707_vm0, %v1705_v5 }
  0xaa   : > { %v584_v49 = vpop.permute.xlu0 %583  ;;  %v586_v52 = vpop.permute.xlu1 %585 }
  0xab   : > { %v589_v50 = vsel %vm587_vm6, %v582_v47, %v584_v49  ;;  %v590_v54 = vsel %vm587_vm6, %v584_v49, %v586_v52 }
  0xac   : > { %1457 = vmatprep.subr.msk.bf16.mxu0 %vm242_vm2, %v589_v50  ;;  %v601_v55 = vsel %vm242_vm2, %v590_v54, 0 }
  0xad   : > { %618 = vmatpush1.bf16.msra.mxu0 %v595_v51  ;;  %1542 = vmatpush3.bf16.msra.mxu1 %v601_v55 }
  0xae   : > { %v812_v56 = vpop.permute.xlu0 %811  ;;  %1463 = vmatprep.subr.msk.bf16.mxu0 %vm242_vm2, %v1806_v11  ;;  %1547 = vmatprep.subr.bf16.mxu1 %v1705_v5  ;;  %v814_v58 = vpop.permute.xlu1 %813  ;;  %v1638_v11 = vld [vmem:[%s2031_s1 + $0x28] sm:$0xff]  }
  0xaf   : > { %v818_v61 = vsel %vm817_vm7, %v812_v56, %v814_v58 }
  0xb0   : > { %1458 = vmatmul.mubr.msk.bf16.vlgmr.msra.gmra.mxu0 %vm238_vm3, %v1636_v53  ;;  %1544 = vmatmul.mubr.msk.bf16.vlgmr.msra.gmra.mxu1 %vm238_vm3, %v1636_v53  ;;  %v824_v1 = vsel %vm242_vm2, %v818_v61, 0 }
  0xb1   : > { %728 = vmatpush1.bf16.msra.mxu0 %v705_v57  ;;  %745 = vmatprep.mubr.bf16.mxu0 %v1706_v6 }
  0xb2   : > { %v816_v60 = vpop.permute.xlu0 %815  ;;  %1548 = vmatpush3.bf16.msra.mxu1 %v711_v59  ;;  %1549 = vmatprep.mubr.msk.bf16.mxu1 %vm1707_vm0, %v1705_v5  ;;  %v931_v0 = vpop.permute.xlu1 %930 }
  0xb3   : > { %v819_v62 = vsel %vm817_vm7, %v814_v58, %v816_v60  ;;  %1553 = vmatprep.subr.bf16.mxu1 %v1705_v5  ;;  %v830_v4 = vsel %vm242_vm2, %v816_v60, 0 }
  0xb4   : > { %1469 = vmatprep.subr.msk.bf16.mxu0 %vm242_vm2, %v819_v62 }
  0xb6   : > { %v933_v2 = vpop.permute.xlu0 %932  ;;  %v935_v7 = vpop.permute.xlu1 %934 }
  0xb7   : > { %v938_v8 = vsel %vm936_vm8, %v933_v2, %v935_v7  ;;  %v937_v10 = vsel %vm936_vm8, %v931_v0, %v933_v2  ;;  %v949_v16 = vsel %vm242_vm2, %v935_v7, 0 }
  0xb8   : > { %1464 = vmatmul.mubr.msk.bf16.vlgmr.msra.gmra.mxu0 %vm238_vm3, %v1637_v63  ;;  %1550 = vmatmul.mubr.msk.bf16.vlgmr.msra.gmra.mxu1 %vm238_vm3, %v1637_v63  ;;  %v943_v13 = vsel %vm242_vm2, %v937_v10, 0 }
  0xb9   : > { %847 = vmatpush1.bf16.msra.mxu0 %v824_v1  ;;  %864 = vmatprep.mubr.bf16.mxu0 %v1706_v6 }
  0xba   : > { %1475 = vmatprep.subr.msk.bf16.mxu0 %vm242_vm2, %v938_v8  ;;  %v1050_v9 = vpop.permute.xlu0 %1049  ;;  %1554 = vmatpush3.bf16.msra.mxu1 %v830_v4  ;;  %v1052_v12 = vpop.permute.xlu1 %1051 }
  0xbb   : > { %1555 = vmatprep.mubr.msk.bf16.mxu1 %vm1707_vm0, %v1705_v5  ;;  %1559 = vmatprep.subr.bf16.mxu1 %v1705_v5  ;;  %v1056_v18 = vsel %vm1055_vm9, %v1050_v9, %v1052_v12 }
  0xbc   : > { %v1062_v22 = vsel %vm242_vm2, %v1056_v18, 0 }
  0xbe   : > { %v1054_v14 = vpop.permute.xlu0 %1053  ;;  %v1169_v17 = vpop.permute.xlu1 %1168 }
  0xbf   : > { %v1057_v15 = vsel %vm1055_vm9, %v1052_v12, %v1054_v14  ;;  %v1068_v24 = vsel %vm242_vm2, %v1054_v14, 0 }
  0xc0   : > { %1470 = vmatmul.mubr.msk.bf16.vlgmr.msra.gmra.mxu0 %vm238_vm3, %v1638_v11  ;;  %1556 = vmatmul.mubr.msk.bf16.vlgmr.msra.gmra.mxu1 %vm238_vm3, %v1638_v11 }
  0xc1   : > { %966 = vmatpush1.bf16.msra.mxu0 %v943_v13  ;;  %983 = vmatprep.mubr.bf16.mxu0 %v1706_v6 }
  0xc2   : > { %1481 = vmatprep.subr.msk.bf16.mxu0 %vm242_vm2, %v1057_v15  ;;  %1560 = vmatpush3.bf16.msra.mxu1 %v949_v16  ;;  %v1171_v20 = vpop.permute.xlu0 %1170  ;;  %v1173_v21 = vpop.permute.xlu1 %1172 }
  0xc3   : > { %1561 = vmatprep.mubr.msk.bf16.mxu1 %vm1707_vm0, %v1705_v5  ;;  %1565 = vmatprep.subr.bf16.mxu1 %v1705_v5  ;;  %v1176_v23 = vsel %vm1174_vm10, %v1171_v20, %v1173_v21  ;;  %v1175_v25 = vsel %vm1174_vm10, %v1169_v17, %v1171_v20  ;;  %v1187_v28 = vsel %vm242_vm2, %v1173_v21, 0 }
  0xc4   : > { %v1181_v27 = vsel %vm242_vm2, %v1175_v25, 0 }
  0xc8   : > { %1476 = vmatmul.mubr.msk.bf16.vlgmr.msra.gmra.mxu0 %vm238_vm3, %v1639_v19  ;;  %1562 = vmatmul.mubr.msk.bf16.vlgmr.msra.gmra.mxu1 %vm238_vm3, %v1639_v19 }
  0xc9   : > { %1085 = vmatpush1.bf16.msra.mxu0 %v1062_v22  ;;  %1102 = vmatprep.mubr.bf16.mxu0 %v1706_v6 }
  0xca   : > { %1487 = vmatprep.subr.msk.bf16.mxu0 %vm242_vm2, %v1176_v23  ;;  %1566 = vmatpush3.bf16.msra.mxu1 %v1068_v24 }
  0xcb   : > { %1567 = vmatprep.mubr.msk.bf16.mxu1 %vm1707_vm0, %v1705_v5  ;;  %1571 = vmatprep.subr.bf16.mxu1 %v1705_v5 }
  0xd0   : > { %1482 = vmatmul.mubr.msk.bf16.vlgmr.msra.gmra.mxu0 %vm238_vm3, %v1640_v26  ;;  %1568 = vmatmul.mubr.msk.bf16.vlgmr.msra.gmra.mxu1 %vm238_vm3, %v1640_v26 }
  0xd1   : > { %1204 = vmatpush1.bf16.msra.mxu0 %v1181_v27  ;;  %1221 = vmatprep.mubr.bf16.mxu0 %v1706_v6 }
  0xd2   : > { %1572 = vmatpush3.bf16.msra.mxu1 %v1187_v28  ;;  %1573 = vmatprep.mubr.msk.bf16.mxu1 %vm1707_vm0, %v1705_v5 }
  0xd8   : > { %1488 = vmatmul.mubr.msk.bf16.vlgmr.msra.gmra.mxu0 %vm238_vm3, %v1641_v29  ;;  %1574 = vmatmul.mubr.msk.bf16.vlgmr.msra.gmra.mxu1 %vm238_vm3, %v1641_v29 }
 0x158   : > { %v286_v5 = vpop.f32.mrf.mxu0  ;;  %v329_v31 = vpop.f32.mrf.mxu1 }
 0x15a   : > { %v288_v30 = vpop.f32.mrf.mxu0  ;;  %v1527_v33 = vpop.f32.mrf.mxu1 }
 0x15c   : > { %v290_v32 = vpop.f32.mrf.mxu0  ;;  %v1964_v35 = vpop.f32.mrf.mxu1 }
 0x15e   : > { %v292_v34 = vpop.f32.mrf.mxu0  ;;  %v1528_v36 = vpop.f32.mrf.mxu1 }
 0x160   : > { %v399_v37 = vpop.f32.mrf.mxu0  ;;  %v442_v39 = vpop.f32.mrf.mxu1 }
 0x161   : > { %v400_v18 = vadd.f32 %v399_v37, %v286_v5  ;;  %v443_v22 = vadd.f32 %v442_v39, %v329_v31 }
 0x162   : > { %v401_v38 = vpop.f32.mrf.mxu0  ;;  %v1533_v41 = vpop.f32.mrf.mxu1 }
 0x163   : > { %v402_v21 = vadd.f32 %v401_v38, %v288_v30 }
 0x164   : > { %v403_v40 = vpop.f32.mrf.mxu0  ;;  %v445_v43 = vpop.f32.mrf.mxu1 }
 0x165   : > { %v404_v26 = vadd.f32 %v403_v40, %v290_v32  ;;  %v446_v5 = vadd.f32 %v445_v43, %v1964_v35  ;;  %v1307_v35 = vsub.s32 0, %v1794_v3 }
 0x166   : > { %v405_v42 = vpop.f32.mrf.mxu0  ;;  %v1534_v44 = vpop.f32.mrf.mxu1 }
 0x167   : > { %v406_v33 = vadd.f32 %v405_v42, %v292_v34 }
 0x168   : > { %v515_v45 = vpop.f32.mrf.mxu0  ;;  %v558_v6 = vpop.f32.mrf.mxu1 }
 0x169   : > { %v565_v23 = vadd.f32 %v515_v45, %v400_v18  ;;  %v567_v28 = vadd.f32 %v558_v6, %v443_v22 }
 0x16a   : > { %v517_v46 = vpop.f32.mrf.mxu0  ;;  %v1539_v48 = vpop.f32.mrf.mxu1 }
 0x16b   : > { %v566_v27 = vadd.f32 %v517_v46, %v402_v21 }
 0x16c   : > { %v519_v47 = vpop.f32.mrf.mxu0  ;;  %v561_v50 = vpop.f32.mrf.mxu1 }
 0x16d   : > { %v568_v44 = vadd.f32 %v519_v47, %v404_v26  ;;  %v570_v32 = vadd.f32 %v561_v50, %v446_v5  ;;  %v1303_v50 = vld [vmem:[%s2033_s3] sm:$0x7] }
 0x16e   : > { %v521_v49 = vpop.f32.mrf.mxu0  ;;  %v1540_v51 = vpop.f32.mrf.mxu1 }
 0x16f   : > { %v569_v37 = vadd.f32 %v521_v49, %v406_v33 }
 0x170   : > { %v637_v52 = vpop.f32.mrf.mxu0  ;;  %v680_v54 = vpop.f32.mrf.mxu1 }
 0x171   : > { %v687_v29 = vadd.f32 %v637_v52, %v565_v23  ;;  %v689_v51 = vadd.f32 %v680_v54, %v567_v28 }
 0x172   : > { %v639_v53 = vpop.f32.mrf.mxu0  ;;  %v1545_v56 = vpop.f32.mrf.mxu1 }
 0x173   : > { %v688_v48 = vadd.f32 %v639_v53, %v566_v27 }
 0x174   : > { %v641_v55 = vpop.f32.mrf.mxu0  ;;  %v683_v58 = vpop.f32.mrf.mxu1 }
 0x175   : > { %v690_v31 = vadd.f32 %v641_v55, %v568_v44  ;;  %v692_v53 = vadd.f32 %v683_v58, %v570_v32  ;;  %v1311_v58 = vsub.s32 1, %v1794_v3 }
 0x176   : > { %v643_v57 = vpop.f32.mrf.mxu0  ;;  %v1546_v59 = vpop.f32.mrf.mxu1 }
 0x177   : > { %v691_v40 = vadd.f32 %v643_v57, %v569_v37  ;;  %v1284_v57 = vpop.permute.xlu0 %1283  ;;  %v1312_v26 = vrot.slane %v1303_v50, %v1311_v58 }
 0x178   : > { %v747_v60 = vpop.f32.mrf.mxu0  ;;  %v790_v62 = vpop.f32.mrf.mxu1 }
 0x179   : > { %v797_v56 = vadd.f32 %v747_v60, %v687_v29  ;;  %v799_v39 = vadd.f32 %v790_v62, %v689_v51 }
 0x17a   : > { %v749_v61 = vpop.f32.mrf.mxu0  ;;  %v1551_v0 = vpop.f32.mrf.mxu1 }
 0x17b   : > { %v798_v38 = vadd.f32 %v749_v61, %v688_v48 }
 0x17c   : > { %v751_v63 = vpop.f32.mrf.mxu0  ;;  %v793_v2 = vpop.f32.mrf.mxu1 }
 0x17d   : > { %v800_v34 = vadd.f32 %v751_v63, %v690_v31  ;;  %v802_v62 = vadd.f32 %v793_v2, %v692_v53 }
 0x17e   : > { %v753_v1 = vpop.f32.mrf.mxu0  ;;  %v1552_v4 = vpop.f32.mrf.mxu1 }
 0x17f   : > { %v801_v54 = vadd.f32 %v753_v1, %v691_v40  ;;  %v1315_v1 = vsub.s32 2, %v1794_v3 }
 0x180   : > { %v866_v7 = vpop.f32.mrf.mxu0  ;;  %v909_v9 = vpop.f32.mrf.mxu1 }
 0x181   : > { %v916_v45 = vadd.f32 %v866_v7, %v797_v56  ;;  %v918_v52 = vadd.f32 %v909_v9, %v799_v39  ;;  %v1316_v27 = vrot.slane %v1303_v50, %v1315_v1 }
 0x182   : > { %v868_v8 = vpop.f32.mrf.mxu0  ;;  %v1557_v11 = vpop.f32.mrf.mxu1 }
 0x183   : > { %v917_v42 = vadd.f32 %v868_v8, %v798_v38 }
 0x184   : > { %v870_v10 = vpop.f32.mrf.mxu0  ;;  %v912_v13 = vpop.f32.mrf.mxu1 }
 0x185   : > { %v919_v43 = vadd.f32 %v870_v10, %v800_v34 }
 0x186   : > { %v872_v12 = vpop.f32.mrf.mxu0  ;;  %v1558_v14 = vpop.f32.mrf.mxu1 }
 0x187   : > { %v920_v63 = vadd.f32 %v872_v12, %v801_v54  ;;  %v921_v14 = vadd.f32 %v912_v13, %v802_v62 }
 0x188   : > { %v985_v15 = vpop.f32.mrf.mxu0  ;;  %v1028_v17 = vpop.f32.mrf.mxu1 }
 0x189   : > { %v1035_v47 = vadd.f32 %v985_v15, %v916_v45  ;;  %v1037_v55 = vadd.f32 %v1028_v17, %v918_v52 }
 0x18a   : > { %v987_v16 = vpop.f32.mrf.mxu0  ;;  %v1563_v20 = vpop.f32.mrf.mxu1 }
 0x18b   : > { %v1036_v49 = vadd.f32 %v987_v16, %v917_v42  ;;  %v1308_v16 = vrot.slane %v1303_v50, %v1307_v35 }
 0x18c   : > { %v989_v19 = vpop.f32.mrf.mxu0  ;;  %v1031_v25 = vpop.f32.mrf.mxu1 }
 0x18d   : > { %v1038_v8 = vadd.f32 %v989_v19, %v919_v43  ;;  %v1040_v12 = vadd.f32 %v1031_v25, %v921_v14 }
 0x18e   : > { %v991_v24 = vpop.f32.mrf.mxu0  ;;  %v1564_v36 = vpop.f32.mrf.mxu1 }
 0x18f   : > { %v1039_v15 = vadd.f32 %v991_v24, %v920_v63 }
 0x190   : > { %v1104_v41 = vpop.f32.mrf.mxu0  ;;  %v1147_v30 = vpop.f32.mrf.mxu1 }
 0x191   : > { %v1154_v61 = vadd.f32 %v1104_v41, %v1035_v47  ;;  %v1156_v11 = vadd.f32 %v1147_v30, %v1037_v55  ;;  %v1289_v41 = vpop.permute.xlu1 %1288 }
 0x192   : > { %v1106_v59 = vpop.f32.mrf.mxu0  ;;  %v1569_v6 = vpop.f32.mrf.mxu1 }
 0x193   : > { %v1155_v9 = vadd.f32 %v1106_v59, %v1036_v49 }
 0x194   : > { %v1108_v46 = vpop.f32.mrf.mxu0  ;;  %v1150_v0 = vpop.f32.mrf.mxu1 }
 0x195   : > { %v1157_v20 = vadd.f32 %v1108_v46, %v1038_v8  ;;  %v1159_v13 = vadd.f32 %v1150_v0, %v1040_v12 }
 0x196   : > { %v1110_v60 = vpop.f32.mrf.mxu0  ;;  %v1570_v4 = vpop.f32.mrf.mxu1 }
 0x197   : > { %v1158_v23 = vadd.f32 %v1110_v60, %v1039_v15 }
 0x198   : > { %v1223_v7 = vpop.f32.mrf.mxu0  ;;  %v1266_v18 = vpop.f32.mrf.mxu1 }
 0x199   : > { %v1273_v10 = vadd.f32 %v1223_v7, %v1154_v61  ;;  %v1275_v2 = vadd.f32 %v1266_v18, %v1156_v11 }
 0x19a   : > { %v1225_v17 = vpop.f32.mrf.mxu0  ;;  %v1575_v29 = vpop.f32.mrf.mxu1 }
 0x19b   : > { %v1291_v21 = vadd.f32 %v1284_v57, %v1273_v10  ;;  %v1274_v22 = vadd.f32 %v1225_v17, %v1155_v9  ;;  %v1293_v33 = vadd.f32 %v1284_v57, %v1275_v2 }
 0x19c   : > { %v1227_v28 = vpop.f32.mrf.mxu0  ;;  %v1269_v44 = vpop.f32.mrf.mxu1 }
 0x19d   : > { %v1297_v3 = vmax.f32 %v1291_v21, 0.0  ;;  %v1292_v19 = vadd.f32 %v1284_v57, %v1274_v22  ;;  %v1276_v36 = vadd.f32 %v1227_v28, %v1157_v20  ;;  %v1299_v51 = vmax.f32 %v1293_v33, 0.0 }
 0x19e   : > { %v1229_v24 = vpop.f32.mrf.mxu0  ;;  %v1278_v25 = vadd.f32 %v1269_v44, %v1159_v13  ;;  %v1576_v37 = vpop.f32.mrf.mxu1 }
 0x19f   : > { %v1298_v48 = vmax.f32 %v1292_v19, 0.0  ;;  %v1277_v56 = vadd.f32 %v1229_v24, %v1158_v23  ;;  %v1294_v5 = vadd.f32 %v1289_v41, %v1276_v36  ;;  %v1320_v59 = vmul.f32 %v1308_v16, %v1297_v3 }
 0x1a0   : > { %v1322_v31 = vmul.f32 %v1316_v27, %v1299_v51  ;;  %v1296_v45 = vadd.f32 %v1289_v41, %v1278_v25 }
 0x1a1   : > { %v1321_v30 = vmul.f32 %v1312_v26, %v1298_v48  ;;  %v1295_v38 = vadd.f32 %v1289_v41, %v1277_v56  ;;  %v1300_v39 = vmax.f32 %v1294_v5, 0.0 }
 0x1a2   : > { %v1501_v40 = vpack.c.bf16 %v1322_v31, %v1322_v31  ;;  %v1302_v6 = vmax.f32 %v1296_v45, 0.0 }
 0x1a3   : > { %v1500_v32 = vpack.c.bf16 %v1321_v30, %v1320_v59  ;;  %v1301_v46 = vmax.f32 %v1295_v38, 0.0  ;;  %v1323_v34 = vmul.f32 %v1308_v16, %v1300_v39 }
 0x1a4   : > { %1352 = vst.msk [vmem:[%s1954_s30 + $0xc] sm:$0xf] %vm1351_vm11, %v1501_v40  ;;  %v1325_v52 = vmul.f32 %v1316_v27, %v1302_v6 }
 0x1a5   : > { %1350 = vst [vmem:[%s1954_s30 + $0x4] sm:$0xff] %v1500_v32  ;;  %v1324_v42 = vmul.f32 %v1312_v26, %v1301_v46 }
 0x1a6   : > { %v1503_v53 = vpack.c.bf16 %v1325_v52, %v1325_v52 }
 0x1a7   : > { %v1502_v47 = vpack.c.bf16 %v1324_v42, %v1323_v34 }
 0x1a8   : > { %1354 = vst.msk [vmem:[%s1954_s30 + $0x1c] sm:$0xf] %vm1351_vm11, %v1503_v53 }
 0x1a9   : > { %1353 = vst [vmem:[%s1954_s30 + $0x14] sm:$0xff] %v1502_v47 }
 0x1aa   : > { %1655 = shalt.err (!%p1652_p3)
}
 0x1ab   : > { %s1656_s22 = scalar_lea.hbm %s1981_s11, 512  ;;  %s1660_s28 = scalar_lea.hbm %s2034_s4, 1024 }
 0x1ac   : > { %p1657_p4 = scmp.ne.s32.totalorder %s1981_s11, %s1656_s22  ;;  %p1661_p9 = scmp.lt.s32.totalorder %s1981_s11, %s2034_s4 }
 0x1ad   : > { %p1662_p10 = scmp.lt.s32.totalorder %s1660_s28, %s1656_s22 }
 0x1ae   : > { %p1658_p7 = pnand %p1657_p4, %p1782_p5 }
 0x1af   : > { %p1663_p11 = por %p1662_p10, %p1661_p9 }
 0x1b0   : > { %p1659_p8 = pneg %p1658_p7 }
 0x1b2   : > { %p1664_p12 = pnand %p1663_p11, %p1659_p8 }
 0x1b4   : > { %1667 = shalt.err (!%p1664_p12)
}
 0x1b5   : > { %s1717_s5 = smov 256   ;;  %s1718_s6 = smov 16  }
 0x1b6   : > { %1577 = dma.vmem_to_hbm [thread:$0]  (%p1782_p5), %s1983_s8, 512, %s1981_s11, %s1990_s19, %s1717_s5, %s1717_s5, %s1718_s6  }
 0x1b7 PF: > { %p1583_p13 = scmp.ge.s32.totalorder %s1702_s18, 2  ;;  %s1384_s7 = sand.u32 1, %s1690_s15  }
 0x1b8   : > { %s1385_s9 = scalar_lea.sflag [#allocation3], %s1384_s7 }
 0x1b9   : > { %p1580_p0 = pnand %p1583_p13, %p1786_p6 }
 0x1bb   : > { %p1581_p1 = pneg %p1580_p0 }
 0x1bd   : > { %1685 = dma.done.wait (%p1581_p1), %s1385_s9, 512  }
 0x1be   : > { %1687 = vsyncadd (%p1581_p1), %s1385_s9, 4294966784  ;;  %p14_p2 = scmp.ge.s32.totalorder %s1769_s21, 4   ;;  %s2037_s15 = smov %s1694_s16 }
 0x1bf   : > { %s2038_s16 = smov %s1698_s17  ;;  %s2039_s17 = smov %s1780_s24 }
 0x1c0   : > { %s2040_s18 = smov %s1769_s21  ;;  %16 = sbr.rel (!%p14_p2) target bundleno = 3 (0x3), region = 79 }
 0x1c5   :  { %1390 = vsyncpa [#allocation3], 1 }
 0x1c6   :  { %1392 = vsyncpa [#allocation3 + $0x1], 1 }

</bundles_post_ra>
